<compile_context>
chip_gen: v6e
topology: v6e:2x2x1
jax: 0.10.0
libtpu: 0.0.40
codegen_flags: <defaults>
</compile_context>

<pallas_src>
import functools
import math

import jax
import jax.numpy as jnp
from jax.experimental import pallas as pl
from jax.experimental.pallas import tpu as pltpu

_LANE = 128


def _round_up(n, m):
    return ((n + m - 1) // m) * m


def _make_mlp_kernel(num_layers):
    """Fused kernel: num_layers x (matmul + bias + activation) + output scaling."""

    def kernel(x_ref, w0_ref, w_stack_ref, vec_ref, o_ref):
        # Layer 0: contract over the live K (= input_size); no padded K lanes.
        h = jnp.dot(x_ref[...], w0_ref[...], preferred_element_type=jnp.float32)
        h = jnp.maximum(h + vec_ref[0:1, :], 0.0)            # bias + ReLU (VPU)

        for i in range(1, num_layers):                        # unrolled at trace time
            h = jnp.dot(h, w_stack_ref[i - 1],
                        preferred_element_type=jnp.float32) + vec_ref[i:i + 1, :]
            if i < num_layers - 1:
                h = jnp.maximum(h, 0.0)                       # ReLU (VPU)
            else:
                h = jax.nn.sigmoid(h)                         # Sigmoid (EUP)

        # Fused epilogue: pre-interleaved scale/offset; padded lanes are 0.
        scale = vec_ref[num_layers:num_layers + 1, :]
        offset = vec_ref[num_layers + 1:num_layers + 2, :]
        o_ref[...] = (h * scale + offset).astype(o_ref.dtype)

    return kernel


def _fused_mlp(x, w0, w_stack, vec):
    num_layers = w_stack.shape[0] + 1
    p_hid = w_stack.shape[-1]
    # Grid-free call: single invocation, whole arrays resident in VMEM, no
    # pipeline machinery and no double-buffering.
    return pl.pallas_call(
        _make_mlp_kernel(num_layers),
        out_shape=jax.ShapeDtypeStruct((1, p_hid), jnp.float32),
        in_specs=[pl.BlockSpec(memory_space=pltpu.MemorySpace.VMEM)] * 4,
        out_specs=pl.BlockSpec(memory_space=pltpu.MemorySpace.VMEM),
    )(x, w0, w_stack, vec)


def _encoder_forward(x, packed, *, q):
    out_vec = _fused_mlp(x.reshape(1, -1).astype(jnp.float32),
                         packed["w0"], packed["w_stack"], packed["vec"])
    # Last-layer columns were permuted to interleaved (omega, delta0, deltas)
    # order, so the (q, 3) result is a plain slice + reshape; it is part of the
    # same jitted executable, so there is still a single Python dispatch.
    return out_vec[0, :3 * q].reshape(q, 3)


class EncoderPallas:
    """JAX/Pallas port of the PyTorch Encoder module (single fused kernel)."""

    def __init__(self, q, Q_size, layers, omega_max, delta_max, T, key):
        # layers == 1 is ill-defined in the reference module (epilogue slicing
        # would read a hidden-sized vector); guard it explicitly.
        assert layers >= 2, "Encoder requires layers >= 2"

        self.q = int(q)
        self.omega_max = float(omega_max)
        self.delta_max = float(delta_max)
        self.T = float(T)
        self.input_size = int(Q_size * (Q_size + 1) / 2)
        self.layers = int(layers)

        hidden = self.input_size + 3 * self.q
        dims = [(self.input_size, hidden)]
        for i in range(1, self.layers):
            if i < self.layers - 1:
                dims.append((hidden, hidden))
            else:
                dims.append((hidden, 3 * self.q))

        # PyTorch-style init: U(-1/sqrt(fan_in), 1/sqrt(fan_in)).
        # Weights stored pre-transposed as (in, out) so y = x @ W + b.
        self.params = []
        for (f_in, f_out) in dims:
            key, kw, kb = jax.random.split(key, 3)
            bound = 1.0 / math.sqrt(f_in)
            w = jax.random.uniform(kw, (f_in, f_out), jnp.float32,
                                   minval=-bound, maxval=bound)
            b = jax.random.uniform(kb, (f_out,), jnp.float32,
                                   minval=-bound, maxval=bound)
            self.params.append((w, b))

        # --- Build packed, lane-dense, kernel-ready parameters --------------
        p_hid = _round_up(hidden, _LANE)   # padded width of every row (>= 3q)

        # Interleave permutation: permuted column k = j*3 + c comes from
        # original column c*q + j  =>  reshape(q, 3) yields (omega, d0, ds).
        perm = jnp.asarray(
            [c * self.q + j for j in range(self.q) for c in range(3)],
            jnp.int32)

        # Layer 0 weight: keep K = input_size (no host-side x padding needed),
        # pad only the output columns to p_hid.
        w0, b0 = self.params[0]
        w0_p = jnp.zeros((self.input_size, p_hid), jnp.float32)
        w0_p = w0_p.at[:, :hidden].set(w0)

        # Layers 1..L-1 stacked into one array; biases + scale + offset stacked
        # into one (L+2, p_hid) array (rows: b0..b{L-1}, scale, offset).
        w_stack = jnp.zeros((self.layers - 1, p_hid, p_hid), jnp.float32)
        vec = jnp.zeros((self.layers + 2, p_hid), jnp.float32)
        vec = vec.at[0, :hidden].set(b0)
        for li in range(1, self.layers):
            w, b = self.params[li]
            if li == self.layers - 1:
                w = w[:, perm]
                b = b[perm]
            w_stack = w_stack.at[li - 1, :w.shape[0], :w.shape[1]].set(w)
            vec = vec.at[li, :b.shape[0]].set(b)

        # Fused epilogue constants (standard order -> interleaved -> padded).
        # Zero-padded lanes keep padded output lanes (sigmoid(0)=0.5) at 0.
        scale_std = jnp.concatenate([
            jnp.full((self.q,), self.omega_max, jnp.float32),
            jnp.full((self.q,), self.delta_max, jnp.float32),
            jnp.full((self.q,), self.delta_max / self.T, jnp.float32)])
        offset_std = jnp.concatenate([
            jnp.zeros((self.q,), jnp.float32),
            jnp.full((self.q,), -self.delta_max / 2.0, jnp.float32),
            jnp.full((self.q,), -self.delta_max / (2.0 * self.T), jnp.float32)])
        vec = vec.at[self.layers, :3 * self.q].set(scale_std[perm])
        vec = vec.at[self.layers + 1, :3 * self.q].set(offset_std[perm])

        self._packed = {"w0": w0_p, "w_stack": w_stack, "vec": vec}

        self._forward = jax.jit(functools.partial(_encoder_forward, q=self.q))

    def __call__(self, x):
        # x: (input_size,) float32, matching the 1-D input of the PyTorch forward.
        return self._forward(x, self._packed)


def _reference_forward(enc, x):
    """Pure-JAX reference (mirrors the PyTorch forward) for a correctness check."""
    out = x
    for i, (w, b) in enumerate(enc.params):
        out = out @ w + b
        if i < enc.layers - 1:
            out = jnp.maximum(out, 0.0)
        else:
            out = jax.nn.sigmoid(out)
    q = enc.q
    omega = (out[:q] * enc.omega_max).reshape(q, 1)
    d0 = (-enc.delta_max / 2.0 + out[q:2 * q] * enc.delta_max).reshape(q, 1)
    ds = (-enc.delta_max / (2.0 * enc.T)
          + out[2 * q:] * enc.delta_max / enc.T).reshape(q, 1)
    return jnp.concatenate((omega, d0, ds), axis=1)


if __name__ == "__main__":
    # q=4, Q_size=7 -> input_size = 28, hidden = 40, layers = 3.
    q, Q_size, layers = 4, 7, 3
    omega_max, delta_max, T = 1.0, 2.0, 1.0

    key = jax.random.PRNGKey(0)
    k_params, k_x = jax.random.split(key)

    enc = EncoderPallas(q, Q_size, layers, omega_max, delta_max, T, k_params)

    input_size = int(Q_size * (Q_size + 1) / 2)
    x = jax.random.normal(k_x, (input_size,), jnp.float32)

    out = enc(x)
    out = jax.block_until_ready(out)
    assert out.shape == (q, 3), out.shape

    ref = jax.block_until_ready(_reference_forward(enc, x))
    assert jnp.allclose(out, ref, atol=1e-5, rtol=1e-5), (out, ref)

    print("KERNEL_OK")
</pallas_src>

<mosaic_0001>
module attributes {stable_mosaic.version = 11 : i64} {
  func.func @kernel(%arg0: memref<1x28xf32, #tpu.memory_space<vmem>>, %arg1: memref<28x128xf32, #tpu.memory_space<vmem>>, %arg2: memref<2x128x128xf32, #tpu.memory_space<vmem>>, %arg3: memref<5x128xf32, #tpu.memory_space<vmem>>, %arg4: memref<1x128xf32, #tpu.memory_space<vmem>>) attributes {dimension_semantics = [], scalar_prefetch = 0 : i64, scratch_operands = 0 : i64, tpu.core_type = #tpu.core_type<tc>} {
    %c0 = arith.constant 0 : index
    %c0_0 = arith.constant 0 : index
    %0 = vector.load %arg0[%c0, %c0_0] : memref<1x28xf32, #tpu.memory_space<vmem>>, vector<1x28xf32>
    %c0_1 = arith.constant 0 : index
    %c0_2 = arith.constant 0 : index
    %1 = vector.load %arg1[%c0_1, %c0_2] : memref<28x128xf32, #tpu.memory_space<vmem>>, vector<28x128xf32>
    %cst = arith.constant dense<0.000000e+00> : vector<1x128xf32>
    %2 = tpu.matmul %0, %1, %cst {dimension_numbers = #tpu.dot_dimension_numbers<[1], [0], [0], [1], [0, 0, 1, 1], [], []>} : vector<1x28xf32>, vector<28x128xf32>, vector<1x128xf32> -> vector<1x128xf32>
    %c0_3 = arith.constant 0 : index
    %c0_4 = arith.constant 0 : index
    %3 = vector.load %arg3[%c0_3, %c0_4] : memref<5x128xf32, #tpu.memory_space<vmem>>, vector<1x128xf32>
    %4 = arith.addf %2, %3 : vector<1x128xf32>
    %cst_5 = arith.constant 0.000000e+00 : f32
    %5 = vector.broadcast %cst_5 : f32 to vector<1x128xf32>
    %6 = arith.maximumf %4, %5 : vector<1x128xf32>
    %c0_6 = arith.constant 0 : index
    %c0_7 = arith.constant 0 : index
    %c0_8 = arith.constant 0 : index
    %7 = vector.load %arg2[%c0_6, %c0_7, %c0_8] : memref<2x128x128xf32, #tpu.memory_space<vmem>>, vector<1x128x128xf32>
    %8 = vector.shape_cast %7 : vector<1x128x128xf32> to vector<128x128xf32>
    %cst_9 = arith.constant dense<0.000000e+00> : vector<1x128xf32>
    %9 = tpu.matmul %6, %8, %cst_9 {dimension_numbers = #tpu.dot_dimension_numbers<[1], [0], [0], [1], [0, 0, 1, 1], [], []>} : vector<1x128xf32>, vector<128x128xf32>, vector<1x128xf32> -> vector<1x128xf32>
    %c1 = arith.constant 1 : index
    %c0_10 = arith.constant 0 : index
    %10 = vector.load %arg3[%c1, %c0_10] : memref<5x128xf32, #tpu.memory_space<vmem>>, vector<1x128xf32>
    %11 = arith.addf %9, %10 : vector<1x128xf32>
    %cst_11 = arith.constant 0.000000e+00 : f32
    %12 = vector.broadcast %cst_11 : f32 to vector<1x128xf32>
    %13 = arith.maximumf %11, %12 : vector<1x128xf32>
    %c1_12 = arith.constant 1 : index
    %c0_13 = arith.constant 0 : index
    %c0_14 = arith.constant 0 : index
    %14 = vector.load %arg2[%c1_12, %c0_13, %c0_14] : memref<2x128x128xf32, #tpu.memory_space<vmem>>, vector<1x128x128xf32>
    %15 = vector.shape_cast %14 : vector<1x128x128xf32> to vector<128x128xf32>
    %cst_15 = arith.constant dense<0.000000e+00> : vector<1x128xf32>
    %16 = tpu.matmul %13, %15, %cst_15 {dimension_numbers = #tpu.dot_dimension_numbers<[1], [0], [0], [1], [0, 0, 1, 1], [], []>} : vector<1x128xf32>, vector<128x128xf32>, vector<1x128xf32> -> vector<1x128xf32>
    %c2 = arith.constant 2 : index
    %c0_16 = arith.constant 0 : index
    %17 = vector.load %arg3[%c2, %c0_16] : memref<5x128xf32, #tpu.memory_space<vmem>>, vector<1x128xf32>
    %18 = arith.addf %16, %17 : vector<1x128xf32>
    %19 = arith.negf %18 : vector<1x128xf32>
    %20 = math.exp %19 : vector<1x128xf32>
    %cst_17 = arith.constant 1.000000e+00 : f32
    %21 = vector.broadcast %cst_17 : f32 to vector<1x128xf32>
    %22 = arith.addf %21, %20 : vector<1x128xf32>
    %23 = arith.divf %21, %22 : vector<1x128xf32>
    %c3 = arith.constant 3 : index
    %c0_18 = arith.constant 0 : index
    %24 = vector.load %arg3[%c3, %c0_18] : memref<5x128xf32, #tpu.memory_space<vmem>>, vector<1x128xf32>
    %c4 = arith.constant 4 : index
    %c0_19 = arith.constant 0 : index
    %25 = vector.load %arg3[%c4, %c0_19] : memref<5x128xf32, #tpu.memory_space<vmem>>, vector<1x128xf32>
    %26 = arith.mulf %23, %24 : vector<1x128xf32>
    %27 = arith.addf %26, %25 : vector<1x128xf32>
    %c0_20 = arith.constant 0 : index
    %c0_21 = arith.constant 0 : index
    %28 = vector.load %arg4[%c0_20, %c0_21] : memref<1x128xf32, #tpu.memory_space<vmem>>, vector<1x128xf32>
    tpu.vector_store %arg4[%c0_20, %c0_21], %27 {strides = array<i32>} : memref<1x128xf32, #tpu.memory_space<vmem>>, vector<1x128xf32>,
    return
  }
}

</mosaic_0001>

<bundles_post_ra>
// kernel: squeeze.1
= control target key start
LH: loop header
LB: loop body
LE: loop exit
PB: predicated region body
PF: predicated region fallthrough
CT: control target
= control target key end

     0   :  { %s93_s0 = inlined_call_operand.vmem [shape: f32[12], index: 0, kind: input, shape index: {}]   ;;  %s94_s1 = inlined_call_operand.hbm [shape: f32[4,3], index: 1, kind: output, shape index: {}]  }
   0x1   :  { %v6_v0 = vld [vmem:[%s93_s0] sm:$0x1] }
   0x2   :  { %7 = vst [vmem:[#allocation3] sm:$0x1] %v6_v0 }
   0x3   :  { %2 = vsyncpa [#allocation1], 0  ;;  %s73_s0 = smov 125   ;;  %s74_s8 = smov 119   ;;  %vm9_vm0 = vcmask 23552  }
   0x4   :  { %s75_s9 = smov 122   ;;  %s76_s10 = smov [#allocation0]  }
   0x5   :  { %s41_s11 = sshll.u32 %s76_s10, 4  ;;  %s42_s11 = int_to_ptr.vmem [resolvable:$true] %s41_s11 }
   0x6   :  { %s51_s12 = scalar_lea.vmem %s42_s11, 64  ;;  %p56_p1 = scmp.lt.s32.totalorder %s42_s11, %s42_s11 }
   0x7   :  { %p52_p0 = scmp.ne.s32.totalorder %s42_s11, %s51_s12  ;;  %p57_p2 = scmp.lt.s32.totalorder %s51_s12, %s51_s12 }
   0x9   :  { %v11_v1 = vld [vmem:[#allocation3] sm:$0x1]   ;;  %p58_p3 = por %p57_p2, %p56_p1 }
   0xa   :  { %v23_v2 = vld [vmem:[#allocation3] sm:$0x1]   ;;  %12 = vrot.lane.b32.xlu0 %v11_v1, %s73_s0 }
   0xb   :  { %24 = vrot.lane.b32.xlu1 %v23_v2, %s74_s8  ;;  %v8_v3 = vld [vmem:[#allocation3] sm:$0x1]   ;;  %p59_p4 = pnand %p58_p3, %p52_p0 }
   0xc   :  { %v17_v4 = vld [vmem:[#allocation3] sm:$0x1]   ;;  %10 = vst.msk [vmem:[#allocation2] sm:$0x1] %vm9_vm0, %v8_v3  }
   0xe   :  { %18 = vrot.lane.b32.xlu0 %v17_v4, %s75_s9 }
  0x7c   :  { %v13_v5 = vpop.permute.xlu0 %12  }
  0x7d   :  { %v25_v6 = vpop.permute.xlu1 %24   ;;  %16 = vst.msk [vmem:[#allocation2 + $0x1] sm:$0x1] %vm9_vm0, %v13_v5  }
  0x7e   :  { %28 = vst.msk [vmem:[#allocation2 + $0x3] sm:$0x1] %vm9_vm0, %v25_v6  }
  0x80   :  { %v19_v7 = vpop.permute.xlu0 %18  }
  0x81   :  { %22 = vst.msk [vmem:[#allocation2 + $0x2] sm:$0x1] %vm9_vm0, %v19_v7  }
  0x88   :  { %v33_v8 = vld [vmem:[#allocation2] sm:$0xf] }
  0x89   :  { %36 = vst [vmem:[#allocation0] sm:$0xf] %v33_v8 }
  0x8a   :  { %62 = shalt.err (!%p59_p4)
}
  0x8b   :  { %44 = dma.vmem_to_hbm [thread:$0]  %s42_s11, 64, %s94_s1, [#allocation1]  }
  0x8c   :  { %71 = dma.done.wait [#allocation1], 64  }
  0x8d   :  { %72 = vsyncadd [#allocation1], 4294967232 }
  0x8e   :  { %46 = vsyncpa [#allocation1], 1 }

// kernel: _encoder_forward.1
= control target key start
LH: loop header
LB: loop body
LE: loop exit
PB: predicated region body
PF: predicated region fallthrough
CT: control target
= control target key end

     0   :  { %9 = vsyncpa [#allocation3], 0  ;;  %s621_s0 = inlined_call_operand.vmem [shape: f32[1,28], index: 0, kind: input, shape index: {}]   ;;  %s622_s1 = inlined_call_operand.hbm [shape: f32[28,128], index: 1, kind: input, shape index: {}]   ;;  %s623_s2 = inlined_call_operand.hbm [shape: f32[2,128,128], index: 2, kind: input, shape index: {}]   ;;  %s624_s3 = inlined_call_operand.hbm [shape: f32[5,128], index: 3, kind: input, shape index: {}]   ;;  %s625_s4 = inlined_call_operand.vmem [shape: f32[1,128], index: 4, kind: output, shape index: {}]  }
   0x1   :  { %10 = vsyncpa [#allocation5], 0  ;;  %s532_s15 = smov [#allocation4]   ;;  %s533_s17 = smov [#allocation2]  }
   0x2   :  { %s30_s16 = sshll.u32 %s532_s15, 4  ;;  %s18_s18 = sshll.u32 %s533_s17, 4  ;;  %s31_s16 = int_to_ptr.vmem [resolvable:$true] %s30_s16  ;;  %s19_s18 = int_to_ptr.vmem [resolvable:$true] %s18_s18 }
   0x3   :  { %s476_s19 = scalar_lea.vmem %s31_s16, 4096  ;;  %p481_p1 = scmp.lt.s32.totalorder %s31_s16, %s31_s16 }
   0x4   :  { %p477_p0 = scmp.ne.s32.totalorder %s31_s16, %s476_s19  ;;  %p482_p2 = scmp.lt.s32.totalorder %s476_s19, %s476_s19 }
   0x6   :  { %p483_p3 = por %p482_p2, %p481_p1 }
   0x8   :  { %p484_p4 = pnand %p483_p3, %p477_p0 }
   0xa   :  { %487 = shalt.err (!%p484_p4)
}
   0xb   :  { %s534_s20 = smov 128   ;;  %s535_s21 = smov 8  }
   0xc   :  { %36 = dma.hbm_to_vmem [thread:$0]  %s623_s2, 4096, %s31_s16, [#allocation5], %s534_s20, %s534_s20, %s535_s21  }
   0xd   :  { %s496_s24 = scalar_lea.vmem %s19_s18, 512  ;;  %p501_p6 = scmp.lt.s32.totalorder %s19_s18, %s19_s18 }
   0xe   :  { %p497_p5 = scmp.ne.s32.totalorder %s19_s18, %s496_s24  ;;  %p502_p7 = scmp.lt.s32.totalorder %s496_s24, %s496_s24 }
  0x10   :  { %p503_p8 = por %p502_p7, %p501_p6 }
  0x12   :  { %p504_p9 = pnand %p503_p8, %p497_p5 }
  0x14   :  { %507 = shalt.err (!%p504_p9)
}
  0x15   :  { %24 = dma.hbm_to_vmem [thread:$0]  %s622_s1, 512, %s19_s18, [#allocation3], %s534_s20, %s534_s20, %s535_s21  }
  0x16   :  { %s536_s27 = smov [#allocation6]  }
  0x17   :  { %s43_s28 = sshll.u32 %s536_s27, 4  ;;  %s44_s28 = int_to_ptr.vmem [resolvable:$true] %s43_s28 }
  0x18   :  { %s516_s29 = scalar_lea.vmem %s44_s28, 128  ;;  %p521_p11 = scmp.lt.s32.totalorder %s44_s28, %s44_s28 }
  0x19   :  { %p517_p10 = scmp.ne.s32.totalorder %s44_s28, %s516_s29  ;;  %p522_p12 = scmp.lt.s32.totalorder %s516_s29, %s516_s29 }
  0x1b   :  { %p523_p13 = por %p522_p12, %p521_p11 }
  0x1d   :  { %p524_p0 = pnand %p523_p13, %p517_p10 }
  0x1f   :  { %527 = shalt.err (!%p524_p0)
}
  0x20   :  { %46 = dma.hbm_to_vmem [thread:$0]  %s624_s3, 128, %s44_s28, [#allocation5]  }
  0x21   :  { %528 = dma.done.wait [#allocation3], 512  }
  0x22   :  { %529 = vsyncadd [#allocation3], 4294966784 }
  0x23   :  { %530 = dma.done.wait [#allocation5], 4224  }
  0x24   :  { %531 = vsyncadd [#allocation5], 4294963072  ;;  %v537_v0 = vmov 0.0   ;;  %vm538_vm0 = vmmov 0   ;;  %vm66_vm1 = vcmask 1043456   ;;  %v59_v2 = vld [vmem:[#allocation2 + $0x10] sm:$0xff] }
  0x25   :  { %376 = vmatprep.subr.mxu0 %v537_v0  ;;  %384 = vmatprep.mubr.msk.f32.mxu0 %vm538_vm0, %v537_v0  ;;  %v60_v1 = vld [vmem:[#allocation2 + $0x18] sm:$0xf]  ;;  %v58_v4 = vld [vmem:[#allocation2 + $0x8] sm:$0xff]  ;;  %v155_v5 = vld [vmem:[#allocation4 + $0x70] sm:$0xff]  ;;  %vm62_vm2 = vcmask 228352  }
  0x26   :  { %387 = vmatprep.subr.mxu1 %v537_v0  ;;  %419 = vmatprep.mubr.msk.f32.mxu1 %vm538_vm0, %v537_v0  ;;  %v156_v3 = vld [vmem:[#allocation4 + $0x78] sm:$0xff]  ;;  %v154_v6 = vld [vmem:[#allocation4 + $0x68] sm:$0xff]  ;;  %v57_v7 = vld [vmem:[#allocation2] sm:$0xff] }
  0x27   :  { %377 = vmatpush3.msk.msra.mxu0 %vm66_vm1, %v60_v1  ;;  %388 = vmatpush3.msra.mxu1 %v156_v3  ;;  %v56_v8 = vld [vmem:[%s621_s0] sm:$0x1]  ;;  %v152_v10 = vld [vmem:[#allocation4 + $0x58] sm:$0xff]  ;;  %v151_v11 = vld [vmem:[#allocation4 + $0x50] sm:$0xff] }
  0x28   :  { %378 = vmatprep.subr.mxu0 %v537_v0  ;;  %389 = vmatprep.subr.mxu1 %v537_v0  ;;  %v153_v9 = vld [vmem:[#allocation4 + $0x60] sm:$0xff]  ;;  %v150_v12 = vld [vmem:[#allocation4 + $0x48] sm:$0xff]  ;;  %v148_v14 = vld [vmem:[#allocation4 + $0x38] sm:$0xff] }
  0x29   :  { %379 = vmatpush3.msra.mxu0 %v59_v2  ;;  %390 = vmatpush3.msra.mxu1 %v155_v5  ;;  %v149_v13 = vld [vmem:[#allocation4 + $0x40] sm:$0xff]  ;;  %v147_v15 = vld [vmem:[#allocation4 + $0x30] sm:$0xff]  ;;  %v146_v16 = vld [vmem:[#allocation4 + $0x28] sm:$0xff] }
  0x2a   :  { %380 = vmatprep.subr.mxu0 %v537_v0  ;;  %391 = vmatprep.subr.mxu1 %v537_v0  ;;  %v145_v17 = vld [vmem:[#allocation4 + $0x20] sm:$0xff]  ;;  %v144_v18 = vld [vmem:[#allocation4 + $0x18] sm:$0xff]  ;;  %v143_v19 = vld [vmem:[#allocation4 + $0x10] sm:$0xff] }
  0x2b   :  { %381 = vmatpush3.msra.mxu0 %v58_v4  ;;  %392 = vmatpush3.msra.mxu1 %v154_v6  ;;  %v142_v20 = vld [vmem:[#allocation4 + $0x8] sm:$0xff]  ;;  %v141_v21 = vld [vmem:[#allocation4] sm:$0xff]  ;;  %v245_v22 = vld [vmem:[#allocation4 + $0xf8] sm:$0xff] }
  0x2c   :  { %382 = vmatprep.subr.mxu0 %v537_v0  ;;  %393 = vmatprep.subr.mxu1 %v537_v0  ;;  %v244_v23 = vld [vmem:[#allocation4 + $0xf0] sm:$0xff]  ;;  %v243_v24 = vld [vmem:[#allocation4 + $0xe8] sm:$0xff]  ;;  %v242_v25 = vld [vmem:[#allocation4 + $0xe0] sm:$0xff] }
  0x2d   :  { %383 = vmatpush3.msra.mxu0 %v57_v7  ;;  %394 = vmatpush3.msra.mxu1 %v153_v9  ;;  %v241_v26 = vld [vmem:[#allocation4 + $0xd8] sm:$0xff]  ;;  %v240_v27 = vld [vmem:[#allocation4 + $0xd0] sm:$0xff]  ;;  %v239_v28 = vld [vmem:[#allocation4 + $0xc8] sm:$0xff] }
  0x2e   :  { %385 = vmatmul.mubr.msk.f32.vlgmr.msra.gmra.mxu0 %vm62_vm2, %v56_v8  ;;  %395 = vmatprep.subr.mxu1 %v537_v0  ;;  %v238_v29 = vld [vmem:[#allocation4 + $0xc0] sm:$0xff]  ;;  %v237_v30 = vld [vmem:[#allocation4 + $0xb8] sm:$0xff]  ;;  %v236_v31 = vld [vmem:[#allocation4 + $0xb0] sm:$0xff] }
  0x2f   :  { %422 = vmatprep.subr.mxu0 %v537_v0  ;;  %396 = vmatpush3.msra.mxu1 %v152_v10  ;;  %v235_v32 = vld [vmem:[#allocation4 + $0xa8] sm:$0xff]  ;;  %v234_v33 = vld [vmem:[#allocation4 + $0xa0] sm:$0xff]  ;;  %v233_v34 = vld [vmem:[#allocation4 + $0x98] sm:$0xff] }
  0x30   :  { %454 = vmatprep.mubr.msk.f32.mxu0 %vm538_vm0, %v537_v0  ;;  %397 = vmatprep.subr.mxu1 %v537_v0  ;;  %v61_v35 = vld [vmem:[#allocation6] sm:$0x1]  ;;  %v232_v40 = vld [vmem:[#allocation4 + $0x90] sm:$0xff]  ;;  %v231_v41 = vld [vmem:[#allocation4 + $0x88] sm:$0xff] }
  0x31   :  { %398 = vmatpush3.msra.mxu1 %v151_v11  ;;  %423 = vmatpush3.msra.mxu0 %v245_v22  ;;  %v230_v42 = vld [vmem:[#allocation4 + $0x80] sm:$0xff] }
  0x32   :  { %399 = vmatprep.subr.mxu1 %v537_v0  ;;  %424 = vmatprep.subr.mxu0 %v537_v0  ;;  %v157_v43 = vld [vmem:[#allocation6 + $0x1] sm:$0x1]  ;;  %v246_v48 = vld [vmem:[#allocation6 + $0x2] sm:$0x1]  ;;  %v323_v55 = vld [vmem:[#allocation6 + $0x3] sm:$0x1] }
  0x33   :  { %400 = vmatpush3.msra.mxu1 %v150_v12  ;;  %425 = vmatpush3.msra.mxu0 %v244_v23  ;;  %v324_v57 = vld [vmem:[#allocation6 + $0x4] sm:$0x1] }
  0x34   :  { %401 = vmatprep.subr.mxu1 %v537_v0  ;;  %426 = vmatprep.subr.mxu0 %v537_v0 }
  0x35   :  { %402 = vmatpush3.msra.mxu1 %v149_v13  ;;  %427 = vmatpush3.msra.mxu0 %v243_v24 }
  0x36   :  { %403 = vmatprep.subr.mxu1 %v537_v0  ;;  %428 = vmatprep.subr.mxu0 %v537_v0 }
  0x37   :  { %404 = vmatpush3.msra.mxu1 %v148_v14  ;;  %429 = vmatpush3.msra.mxu0 %v242_v25 }
  0x38   :  { %405 = vmatprep.subr.mxu1 %v537_v0  ;;  %430 = vmatprep.subr.mxu0 %v537_v0 }
  0x39   :  { %406 = vmatpush3.msra.mxu1 %v147_v15  ;;  %431 = vmatpush3.msra.mxu0 %v241_v26 }
  0x3a   :  { %407 = vmatprep.subr.mxu1 %v537_v0  ;;  %432 = vmatprep.subr.mxu0 %v537_v0 }
  0x3b   :  { %408 = vmatpush3.msra.mxu1 %v146_v16  ;;  %433 = vmatpush3.msra.mxu0 %v240_v27 }
  0x3c   :  { %409 = vmatprep.subr.mxu1 %v537_v0  ;;  %434 = vmatprep.subr.mxu0 %v537_v0 }
  0x3d   :  { %410 = vmatpush3.msra.mxu1 %v145_v17  ;;  %435 = vmatpush3.msra.mxu0 %v239_v28 }
  0x3e   :  { %411 = vmatprep.subr.mxu1 %v537_v0  ;;  %436 = vmatprep.subr.mxu0 %v537_v0 }
  0x3f   :  { %412 = vmatpush3.msra.mxu1 %v144_v18  ;;  %437 = vmatpush3.msra.mxu0 %v238_v29 }
  0x40   :  { %413 = vmatprep.subr.mxu1 %v537_v0  ;;  %438 = vmatprep.subr.mxu0 %v537_v0 }
  0x41   :  { %414 = vmatpush3.msra.mxu1 %v143_v19  ;;  %439 = vmatpush3.msra.mxu0 %v237_v30 }
  0x42   :  { %415 = vmatprep.subr.mxu1 %v537_v0  ;;  %440 = vmatprep.subr.mxu0 %v537_v0 }
  0x43   :  { %416 = vmatpush3.msra.mxu1 %v142_v20  ;;  %441 = vmatpush3.msra.mxu0 %v236_v31 }
  0x44   :  { %417 = vmatprep.subr.mxu1 %v537_v0  ;;  %442 = vmatprep.subr.mxu0 %v537_v0 }
  0x45   :  { %418 = vmatpush3.msra.mxu1 %v141_v21  ;;  %443 = vmatpush3.msra.mxu0 %v235_v32 }
  0x46   :  { %444 = vmatprep.subr.mxu0 %v537_v0 }
  0x47   :  { %445 = vmatpush3.msra.mxu0 %v234_v33 }
  0x48   :  { %446 = vmatprep.subr.mxu0 %v537_v0 }
  0x49   :  { %447 = vmatpush3.msra.mxu0 %v233_v34 }
  0x4a   :  { %448 = vmatprep.subr.mxu0 %v537_v0 }
  0x4b   :  { %449 = vmatpush3.msra.mxu0 %v232_v40 }
  0x4c   :  { %450 = vmatprep.subr.mxu0 %v537_v0 }
  0x4d   :  { %451 = vmatpush3.msra.mxu0 %v231_v41 }
  0x4e   :  { %452 = vmatprep.subr.mxu0 %v537_v0 }
  0x4f   :  { %453 = vmatpush3.msra.mxu0 %v230_v42 }
  0xee   :  { %v136_v36 = vpop.f32.mrf.mxu0 }
  0xef   :  { %v137_v37 = vadd.f32 %v136_v36, %v61_v35 }
  0xf0   :  { %v386_v38 = vpop.f32.mrf.mxu0 }
  0xf1   :  { %v140_v39 = vmax.f32 %v137_v37, 0.0 }
  0xf3   :  { %420 = vmatmul.mubr.f32.vlgmr.msra.gmra.mxu1 %v140_v39 }
 0x1b3   :  { %v224_v44 = vpop.f32.mrf.mxu1 }
 0x1b4   :  { %v225_v45 = vadd.f32 %v224_v44, %v157_v43 }
 0x1b5   :  { %v421_v46 = vpop.f32.mrf.mxu1 }
 0x1b6   :  { %v228_v47 = vmax.f32 %v225_v45, 0.0 }
 0x1b8   :  { %455 = vmatmul.mubr.f32.vlgmr.msra.gmra.mxu0 %v228_v47 }
 0x278   :  { %v313_v49 = vpop.f32.mrf.mxu0 }
 0x279   :  { %v314_v50 = vadd.f32 %v313_v49, %v246_v48 }
 0x27a   :  { %v456_v51 = vpop.f32.mrf.mxu0 }
 0x27b   :  { %v336_v52 = vmul.f32 -1.442695, %v314_v50 }
 0x27d   :  { %464 = vpow2.f32 %v336_v52 }
 0x28a   :  { %v465_v53 = vpop.eup %464 }
 0x28b   :  { %v320_v54 = vadd.f32 1.0, %v465_v53 }
 0x28d   :  { %466 = vrcp.f32 %v320_v54 }
 0x29a   :  { %v467_v56 = vpop.eup %466 }
 0x29b   :  { %v325_v58 = vmul.f32 %v467_v56, %v323_v55 }
 0x29d   :  { %v326_v59 = vadd.f32 %v325_v58, %v324_v57 }
 0x29f   :  { %327 = vst [vmem:[%s625_s4] sm:$0x1] %v326_v59 }
 0x2a0   :  { %332 = vsyncpa [#allocation3], 1 }
 0x2a1   :  { %333 = vsyncpa [#allocation5], 1 }

</bundles_post_ra>
